<compile_context>
chip_gen: v6e
topology: v6e:2x2x1
jax: 0.10.0
libtpu: 0.0.40
codegen_flags: <defaults>
</compile_context>

<pallas_src>
import numpy as np
import jax
import jax.numpy as jnp
from jax.experimental import pallas as pl
from jax.experimental.pallas import tpu as pltpu

N, CIN, H, W = 2, 4, 16, 16        # batch, in-channels, spatial
COUT = 8                           # base_model conv output channels
KH = KW = 3                        # conv kernel
NUM_CLASSES = 10                   # head output
CLS_PAD = 128                      # lane-padded class dim (unmasked store)
HWP = H * W                        # 256
NHW = N * H * W                    # 512  (lane axis everywhere)
NTAPS = KH * KW                    # 9
SLAB = 8                           # sublane-aligned rows per tap
KPAD = NTAPS * SLAB                # 72   (padded im2col contraction depth)
BIAS_ROW = CIN                     # row 4 of the tap-0 slab carries all-ones


def _single_head_kernel(x_ref, cw_ref, mask_ref, pool_ref, hw_ref, hb_ref,
                        out_ref):
    """Fused base_model + head forward (single invocation, no grid).

    x_ref   : (N, CIN, H*W)   raw NCHW input, spatial flattened      (VMEM)
    cw_ref  : (COUT, KPAD)    im2col conv weights, bias folded in    (VMEM)
    mask_ref: (KPAD, NHW)     precomputed halo masks + ones row      (VMEM)
    pool_ref: (N, NHW)        per-batch mean-pool matrix             (VMEM)
    hw_ref  : (COUT, CLS_PAD) head weights, lane-padded to 128       (VMEM)
    hb_ref  : (1, CLS_PAD)    head bias, lane-padded                 (VMEM)
    out_ref : (N, CLS_PAD)    lane-padded logits                     (VMEM)
    """
    # --- NCHW -> (CIN, N*H*W): lane-aligned concat (256-lane batch slabs) ---
    x_t = jnp.concatenate([x_ref[n] for n in range(N)], axis=1)   # (CIN, NHW)
    # (8, NHW) base slab: 4 data rows, 1 ones row (for bias), 3 zero rows.
    x8 = jnp.concatenate(
        [x_t,
         jnp.ones((1, NHW), jnp.float32),
         jnp.zeros((SLAB - CIN - 1, NHW), jnp.float32)], axis=0)   # (8, NHW)

    # --- im2col in registers: 9 lane-rotations * full-width halo masks ---
    # roll(shift = -k mod NHW): out[lane] = x[lane + k]; the precomputed mask
    # zeroes every lane whose source pixel falls outside the image (== the
    # conv's zero padding) or would wrap across the batch boundary.
    slabs = []
    for kh in range(KH):
        for kw in range(KW):
            t = kh * KW + kw
            k = (kh - 1) * W + (kw - 1)
            shift = (-k) % NHW
            rolled = pltpu.roll(x8, shift=shift, axis=1) if shift else x8
            slabs.append(rolled * mask_ref[t * SLAB:(t + 1) * SLAB, :])
    patches = jnp.concatenate(slabs, axis=0)                       # (72, NHW)

    # --- Conv2d(pad=1) + bias (folded via ones row) as ONE MXU matmul,
    #     then ReLU.  (8,72) x (72,512) -> (8,512), lane-dense. ---
    acc = jnp.dot(cw_ref[...], patches, preferred_element_type=jnp.float32)
    feat = jnp.maximum(acc, 0.0)                                   # (COUT,NHW)

    # --- Global average pool as an MXU contraction: (N,NHW) . (COUT,NHW)^T --
    pooled = jax.lax.dot_general(
        pool_ref[...], feat,
        dimension_numbers=(((1,), (1,)), ((), ())),
        preferred_element_type=jnp.float32)                        # (N, COUT)

    # --- Head linear, classes lane-padded to 128 -> unmasked 128-lane store -
    logits = jnp.dot(pooled, hw_ref[...],
                     preferred_element_type=jnp.float32) + hb_ref[...]
    out_ref[...] = logits.astype(out_ref.dtype)                    # (N, 128)


def prepare_params(conv_w, conv_b, head_w, head_b):
    """One-time host-side parameter prep (hoisted out of the hot path).

    conv_w is HWIO (KH, KW, CIN, COUT).  NOTE: real PyTorch Conv2d weights
    are OIHW (COUT, CIN, KH, KW) and would need .transpose(2, 3, 1, 0)
    before calling this.
    """
    conv_w = np.asarray(conv_w, np.float32)
    conv_b = np.asarray(conv_b, np.float32)
    head_w = np.asarray(head_w, np.float32)
    head_b = np.asarray(head_b, np.float32)

    # im2col weight matrix, 8 columns per tap; bias folded into the column
    # that multiplies the all-ones row of tap 0.
    cw = np.zeros((COUT, KPAD), np.float32)
    for kh in range(KH):
        for kw in range(KW):
            t = kh * KW + kw
            cw[:, t * SLAB:t * SLAB + CIN] = conv_w[kh, kw].T      # (COUT,CIN)
    cw[:, BIAS_ROW] = conv_b

    # Per-tap halo masks replicated over the CIN data rows; ones row for bias.
    sp = np.arange(NHW) % HWP
    h_i, w_i = sp // W, sp % W
    masks = np.zeros((NTAPS, SLAB, NHW), np.float32)
    for kh in range(KH):
        for kw in range(KW):
            dh, dw = kh - 1, kw - 1
            valid = ((h_i + dh >= 0) & (h_i + dh < H) &
                     (w_i + dw >= 0) & (w_i + dw < W))
            masks[kh * KW + kw, :CIN, :] = valid.astype(np.float32)[None, :]
    masks[0, BIAS_ROW, :] = 1.0
    masks = masks.reshape(KPAD, NHW)

    # Mean-pool matrix: pool[n, d] = 1/HWP iff lane d belongs to batch n.
    pool = (np.arange(NHW)[None, :] // HWP ==
            np.arange(N)[:, None]).astype(np.float32) / float(HWP)

    # Head params lane-padded to 128 classes.
    hw_pad = np.zeros((COUT, CLS_PAD), np.float32)
    hw_pad[:, :NUM_CLASSES] = head_w
    hb_pad = np.zeros((1, CLS_PAD), np.float32)
    hb_pad[0, :NUM_CLASSES] = head_b

    return tuple(jnp.asarray(a) for a in (cw, masks, pool, hw_pad, hb_pad))


@jax.jit
def single_head_forward(x_nchw, params):
    """Equivalent of SingleHeadModel(base, head, squeeze=True).forward(x)."""
    cw, masks, pool, hw_pad, hb_pad = params
    x3 = x_nchw.reshape(N, CIN, HWP)          # free contiguous reshape only
    vmem = pl.BlockSpec(memory_space=pltpu.MemorySpace.VMEM)
    out_pad = pl.pallas_call(
        _single_head_kernel,
        out_shape=jax.ShapeDtypeStruct((N, CLS_PAD), jnp.float32),
        in_specs=[vmem] * 6,
        out_specs=vmem,
    )(x3, cw, masks, pool, hw_pad, hb_pad)
    return out_pad[:, :NUM_CLASSES]


def _reference(x_nchw, conv_w, conv_b, head_w, head_b):
    """Plain-JAX reference of the same forward pass (for validation)."""
    x_nhwc = jnp.transpose(x_nchw, (0, 2, 3, 1))
    y = jax.lax.conv_general_dilated(
        x_nhwc, conv_w, window_strides=(1, 1), padding="SAME",
        dimension_numbers=("NHWC", "HWIO", "NHWC"))
    y = jax.nn.relu(y + conv_b)
    pooled = jnp.mean(y, axis=(1, 2))
    return pooled @ head_w + head_b


if __name__ == "__main__":
    key = jax.random.PRNGKey(0)
    kx, kcw, kcb, khw, khb = jax.random.split(key, 5)

    # deterministic synthetic parameters (shapes follow the module's __init__)
    x = jax.random.normal(kx, (N, CIN, H, W), jnp.float32)          # NCHW
    conv_w = 0.1 * jax.random.normal(kcw, (KH, KW, CIN, COUT), jnp.float32)
    conv_b = 0.1 * jax.random.normal(kcb, (COUT,), jnp.float32)
    head_w = 0.1 * jax.random.normal(khw, (COUT, NUM_CLASSES), jnp.float32)
    head_b = 0.1 * jax.random.normal(khb, (NUM_CLASSES,), jnp.float32)

    params = prepare_params(conv_w, conv_b, head_w, head_b)  # once, hoisted

    out = single_head_forward(x, params)
    out = jax.block_until_ready(out)

    ref = _reference(x, conv_w, conv_b, head_w, head_b)
    assert out.shape == (N, NUM_CLASSES)
    assert jnp.allclose(out, ref, rtol=1e-3, atol=1e-3), "mismatch vs reference"

    print("KERNEL_OK")
</pallas_src>

<mosaic_0001>
module attributes {stable_mosaic.version = 11 : i64} {
  func.func @_single_head_kernel(%arg0: memref<2x4x256xf32, #tpu.memory_space<vmem>>, %arg1: memref<8x72xf32, #tpu.memory_space<vmem>>, %arg2: memref<72x512xf32, #tpu.memory_space<vmem>>, %arg3: memref<2x512xf32, #tpu.memory_space<vmem>>, %arg4: memref<8x128xf32, #tpu.memory_space<vmem>>, %arg5: memref<1x128xf32, #tpu.memory_space<vmem>>, %arg6: memref<2x128xf32, #tpu.memory_space<vmem>>) attributes {dimension_semantics = [], scalar_prefetch = 0 : i64, scratch_operands = 0 : i64, tpu.core_type = #tpu.core_type<tc>} {
    %c0 = arith.constant 0 : index
    %c0_0 = arith.constant 0 : index
    %c0_1 = arith.constant 0 : index
    %0 = vector.load %arg0[%c0, %c0_0, %c0_1] : memref<2x4x256xf32, #tpu.memory_space<vmem>>, vector<1x4x256xf32>
    %1 = vector.shape_cast %0 : vector<1x4x256xf32> to vector<4x256xf32>
    %c1 = arith.constant 1 : index
    %c0_2 = arith.constant 0 : index
    %c0_3 = arith.constant 0 : index
    %2 = vector.load %arg0[%c1, %c0_2, %c0_3] : memref<2x4x256xf32, #tpu.memory_space<vmem>>, vector<1x4x256xf32>
    %3 = vector.shape_cast %2 : vector<1x4x256xf32> to vector<4x256xf32>
    %4 = tpu.concatenate %1, %3 in 1 : vector<4x256xf32>, vector<4x256xf32> -> vector<4x512xf32>
    %cst = arith.constant 1.000000e+00 : f32
    %5 = vector.broadcast %cst : f32 to vector<1x512xf32>
    %cst_4 = arith.constant 0.000000e+00 : f32
    %6 = vector.broadcast %cst_4 : f32 to vector<3x512xf32>
    %7 = tpu.concatenate %4, %5, %6 in 0 : vector<4x512xf32>, vector<1x512xf32>, vector<3x512xf32> -> vector<8x512xf32>
    %c17_i32 = arith.constant 17 : i32
    %8 = tpu.dynamic_rotate %7 by %c17_i32 dim 1 : vector<8x512xf32>, i32 -> vector<8x512xf32>
    %c0_5 = arith.constant 0 : index
    %c0_6 = arith.constant 0 : index
    %9 = vector.load %arg2[%c0_5, %c0_6] : memref<72x512xf32, #tpu.memory_space<vmem>>, vector<8x512xf32>
    %10 = arith.mulf %8, %9 : vector<8x512xf32>
    %c16_i32 = arith.constant 16 : i32
    %11 = tpu.dynamic_rotate %7 by %c16_i32 dim 1 : vector<8x512xf32>, i32 -> vector<8x512xf32>
    %c8 = arith.constant 8 : index
    %c0_7 = arith.constant 0 : index
    %12 = vector.load %arg2[%c8, %c0_7] : memref<72x512xf32, #tpu.memory_space<vmem>>, vector<8x512xf32>
    %13 = arith.mulf %11, %12 : vector<8x512xf32>
    %c15_i32 = arith.constant 15 : i32
    %14 = tpu.dynamic_rotate %7 by %c15_i32 dim 1 : vector<8x512xf32>, i32 -> vector<8x512xf32>
    %c16 = arith.constant 16 : index
    %c0_8 = arith.constant 0 : index
    %15 = vector.load %arg2[%c16, %c0_8] : memref<72x512xf32, #tpu.memory_space<vmem>>, vector<8x512xf32>
    %16 = arith.mulf %14, %15 : vector<8x512xf32>
    %c1_i32 = arith.constant 1 : i32
    %17 = tpu.dynamic_rotate %7 by %c1_i32 dim 1 : vector<8x512xf32>, i32 -> vector<8x512xf32>
    %c24 = arith.constant 24 : index
    %c0_9 = arith.constant 0 : index
    %18 = vector.load %arg2[%c24, %c0_9] : memref<72x512xf32, #tpu.memory_space<vmem>>, vector<8x512xf32>
    %19 = arith.mulf %17, %18 : vector<8x512xf32>
    %c32 = arith.constant 32 : index
    %c0_10 = arith.constant 0 : index
    %20 = vector.load %arg2[%c32, %c0_10] : memref<72x512xf32, #tpu.memory_space<vmem>>, vector<8x512xf32>
    %21 = arith.mulf %7, %20 : vector<8x512xf32>
    %c511_i32 = arith.constant 511 : i32
    %22 = tpu.dynamic_rotate %7 by %c511_i32 dim 1 : vector<8x512xf32>, i32 -> vector<8x512xf32>
    %c40 = arith.constant 40 : index
    %c0_11 = arith.constant 0 : index
    %23 = vector.load %arg2[%c40, %c0_11] : memref<72x512xf32, #tpu.memory_space<vmem>>, vector<8x512xf32>
    %24 = arith.mulf %22, %23 : vector<8x512xf32>
    %c497_i32 = arith.constant 497 : i32
    %25 = tpu.dynamic_rotate %7 by %c497_i32 dim 1 : vector<8x512xf32>, i32 -> vector<8x512xf32>
    %c48 = arith.constant 48 : index
    %c0_12 = arith.constant 0 : index
    %26 = vector.load %arg2[%c48, %c0_12] : memref<72x512xf32, #tpu.memory_space<vmem>>, vector<8x512xf32>
    %27 = arith.mulf %25, %26 : vector<8x512xf32>
    %c496_i32 = arith.constant 496 : i32
    %28 = tpu.dynamic_rotate %7 by %c496_i32 dim 1 : vector<8x512xf32>, i32 -> vector<8x512xf32>
    %c56 = arith.constant 56 : index
    %c0_13 = arith.constant 0 : index
    %29 = vector.load %arg2[%c56, %c0_13] : memref<72x512xf32, #tpu.memory_space<vmem>>, vector<8x512xf32>
    %30 = arith.mulf %28, %29 : vector<8x512xf32>
    %c495_i32 = arith.constant 495 : i32
    %31 = tpu.dynamic_rotate %7 by %c495_i32 dim 1 : vector<8x512xf32>, i32 -> vector<8x512xf32>
    %c64 = arith.constant 64 : index
    %c0_14 = arith.constant 0 : index
    %32 = vector.load %arg2[%c64, %c0_14] : memref<72x512xf32, #tpu.memory_space<vmem>>, vector<8x512xf32>
    %33 = arith.mulf %31, %32 : vector<8x512xf32>
    %34 = tpu.concatenate %10, %13, %16, %19, %21, %24, %27, %30, %33 in 0 : vector<8x512xf32>, vector<8x512xf32>, vector<8x512xf32>, vector<8x512xf32>, vector<8x512xf32>, vector<8x512xf32>, vector<8x512xf32>, vector<8x512xf32>, vector<8x512xf32> -> vector<72x512xf32>
    %c0_15 = arith.constant 0 : index
    %c0_16 = arith.constant 0 : index
    %35 = vector.load %arg1[%c0_15, %c0_16] : memref<8x72xf32, #tpu.memory_space<vmem>>, vector<8x72xf32>
    %cst_17 = arith.constant dense<0.000000e+00> : vector<8x512xf32>
    %36 = tpu.matmul %35, %34, %cst_17 {dimension_numbers = #tpu.dot_dimension_numbers<[1], [0], [0], [1], [0, 0, 1, 1], [], []>} : vector<8x72xf32>, vector<72x512xf32>, vector<8x512xf32> -> vector<8x512xf32>
    %cst_18 = arith.constant 0.000000e+00 : f32
    %37 = vector.broadcast %cst_18 : f32 to vector<8x512xf32>
    %38 = arith.maximumf %36, %37 : vector<8x512xf32>
    %c0_19 = arith.constant 0 : index
    %c0_20 = arith.constant 0 : index
    %39 = vector.load %arg3[%c0_19, %c0_20] : memref<2x512xf32, #tpu.memory_space<vmem>>, vector<2x512xf32>
    %cst_21 = arith.constant dense<0.000000e+00> : vector<2x8xf32>
    %40 = tpu.matmul %39, %38, %cst_21 {dimension_numbers = #tpu.dot_dimension_numbers<[1], [1], [0], [0], [0, 0, 1, 0], [], []>} : vector<2x512xf32>, vector<8x512xf32>, vector<2x8xf32> -> vector<2x8xf32>
    %c0_22 = arith.constant 0 : index
    %c0_23 = arith.constant 0 : index
    %41 = vector.load %arg4[%c0_22, %c0_23] : memref<8x128xf32, #tpu.memory_space<vmem>>, vector<8x128xf32>
    %cst_24 = arith.constant dense<0.000000e+00> : vector<2x128xf32>
    %42 = tpu.matmul %40, %41, %cst_24 {dimension_numbers = #tpu.dot_dimension_numbers<[1], [0], [0], [1], [0, 0, 1, 1], [], []>} : vector<2x8xf32>, vector<8x128xf32>, vector<2x128xf32> -> vector<2x128xf32>
    %c0_25 = arith.constant 0 : index
    %c0_26 = arith.constant 0 : index
    %43 = vector.load %arg5[%c0_25, %c0_26] : memref<1x128xf32, #tpu.memory_space<vmem>>, vector<1x128xf32>
    %44 = vector.broadcast %43 : vector<1x128xf32> to vector<2x128xf32>
    %45 = arith.addf %42, %44 : vector<2x128xf32>
    %c0_27 = arith.constant 0 : index
    %c0_28 = arith.constant 0 : index
    %46 = vector.load %arg6[%c0_27, %c0_28] : memref<2x128xf32, #tpu.memory_space<vmem>>, vector<2x128xf32>
    tpu.vector_store %arg6[%c0_27, %c0_28], %45 {strides = array<i32>} : memref<2x128xf32, #tpu.memory_space<vmem>>, vector<2x128xf32>,
    return
  }
}

</mosaic_0001>

<bundles_post_ra>
// kernel: single_head_forward.1
= control target key start
LH: loop header
LB: loop body
LE: loop exit
PB: predicated region body
PF: predicated region fallthrough
CT: control target
= control target key end

     0   :  { %11 = vsyncpa [#allocation3], 0  ;;  %s907_s0 = inlined_call_operand.vmem [shape: f32[2,4,256], index: 0, kind: input, shape index: {}]   ;;  %s908_s1 = inlined_call_operand.vmem [shape: f32[8,72], index: 1, kind: input, shape index: {}]   ;;  %s909_s2 = inlined_call_operand.hbm [shape: f32[72,512], index: 2, kind: input, shape index: {}]   ;;  %s910_s3 = inlined_call_operand.vmem [shape: f32[2,512], index: 3, kind: input, shape index: {}]   ;;  %s911_s4 = inlined_call_operand.vmem [shape: f32[8,128], index: 4, kind: input, shape index: {}]   ;;  %s912_s5 = inlined_call_operand.vmem [shape: f32[1,128], index: 5, kind: input, shape index: {}]   ;;  %s913_s6 = inlined_call_operand.hbm [shape: f32[2,128], index: 6, kind: output, shape index: {}]  }
   0x1   :  { %12 = vsyncpa [#allocation4], 0  ;;  %s721_s21 = smov [#allocation2]  }
   0x2   :  { %s22_s22 = sshll.u32 %s721_s21, 4  ;;  %s23_s22 = int_to_ptr.vmem [resolvable:$true] %s22_s22 }
   0x3   :  { %s685_s23 = scalar_lea.vmem %s23_s22, 4608  ;;  %p690_p1 = scmp.lt.s32.totalorder %s23_s22, %s23_s22 }
   0x4   :  { %p686_p0 = scmp.ne.s32.totalorder %s23_s22, %s685_s23  ;;  %p691_p2 = scmp.lt.s32.totalorder %s685_s23, %s685_s23 }
   0x6   :  { %p692_p3 = por %p691_p2, %p690_p1 }
   0x8   :  { %p693_p4 = pnand %p692_p3, %p686_p0 }
   0xa   :  { %696 = shalt.err (!%p693_p4)
}
   0xb   :  { %s722_s24 = smov 512   ;;  %s723_s25 = smov 32  }
   0xc   :  { %28 = dma.hbm_to_vmem [thread:$0]  %s909_s2, 4608, %s23_s22, [#allocation3], %s722_s24, %s722_s24, %s723_s25  }
   0xd   :  { %717 = dma.done.wait [#allocation3], 4608  }
   0xe   :  { %718 = vsyncadd [#allocation3], 4294962688  ;;  %vm47_vm0 = vcmask 1043456   ;;  %vm52_vm1 = vcmask 1044480   ;;  %v647_v0 = vld [vmem:[%s907_s0 + $0x8] sm:$0xff]  ;;  %v38_v1 = vld [vmem:[%s907_s0] sm:$0xff]  ;;  %v65_v13 = vlaneseq }
   0xf   :  { %v50_v2 = vsel %vm47_vm0, %v647_v0, 1.0  ;;  %v48_v3 = vsel %vm47_vm0, %v38_v1, 1.0  ;;  %v45_v4 = vcombine.high %v647_v0, %v647_v0  ;;  %v42_v5 = vcombine.high %v38_v1, %v38_v1  ;;  %s724_s2 = smov 111   ;;  %s725_s0 = smov 112   ;;  %v230_v17 = vld [vmem:[#allocation2 + $0x118] sm:$0xff]  ;;  %v229_v18 = vld [vmem:[#allocation2 + $0x110] sm:$0xff] }
  0x10   :  { %v781_v6 = vsel %vm52_vm1, %v50_v2, 0.0  ;;  %v784_v7 = vsel %vm52_vm1, %v48_v3, 0.0  ;;  %s726_s8 = smov 113   ;;  %s727_s9 = smov 127   ;;  %v731_v12 = vmov 0.0   ;;  %v827_v14 = vand.u32 127, %v65_v13 }
  0x11   :  { %218 = vrot.lane.b32.xlu1 %v781_v6, %s724_s2  ;;  %214 = vrot.lane.b32.xlu0 %v784_v7, %s724_s2  ;;  %v51_v8 = vsel %vm47_vm0, %v45_v4, 1.0  ;;  %v49_v10 = vsel %vm47_vm0, %v42_v5, 1.0  ;;  %s728_s10 = smov 1   ;;  %s729_s11 = smov 15   ;;  %v208_v27 = vld [vmem:[#allocation2 + $0xf0] sm:$0xff]  ;;  %v209_v28 = vld [vmem:[#allocation2 + $0xf8] sm:$0xff] }
  0x12   :  { %v789_v9 = vsel %vm52_vm1, %v51_v8, 0.0  ;;  %v794_v11 = vsel %vm52_vm1, %v49_v10, 0.0  ;;  %s730_s12 = smov 16   ;;  %304 = vmatprep.mubr.f32.mxu0 %v731_v12  ;;  %375 = vmatprep.mubr.f32.mxu1 %v731_v12  ;;  %s732_s13 = smov 17   ;;  %vm222_vm2 = vcmp.lt.s32.totalorder %v827_v14, 111  ;;  %vm201_vm3 = vcmp.lt.s32.totalorder %v827_v14, 112 }
  0x13   :  { %v228_v29 = vld [vmem:[#allocation2 + $0x108] sm:$0xff]  ;;  %v227_v30 = vld [vmem:[#allocation2 + $0x100] sm:$0xff]  ;;  %vm180_vm4 = vcmp.lt.s32.totalorder %v827_v14, 113  ;;  %v188_v49 = vld [vmem:[#allocation2 + $0xd8] sm:$0xff]  ;;  %vm159_vm5 = vcmp.lt.s32.totalorder %v827_v14, 127  ;;  %vm130_vm6 = vcmp.lt.s32.totalorder %v827_v14, 1 }
  0x14   :  { %v207_v35 = vld [vmem:[#allocation2 + $0xe8] sm:$0xff]  ;;  %v206_v40 = vld [vmem:[#allocation2 + $0xe0] sm:$0xff]  ;;  %v187_v51 = vld [vmem:[#allocation2 + $0xd0] sm:$0xff]  ;;  %vm109_vm7 = vcmp.lt.s32.totalorder %v827_v14, 15  ;;  %vm88_vm8 = vcmp.lt.s32.totalorder %v827_v14, 16  ;;  %vm67_vm9 = vcmp.lt.s32.totalorder %v827_v14, 17 }
  0x15   :  { %220 = vrot.lane.b32.xlu1 %v789_v9, %s724_s2  ;;  %193 = vrot.lane.b32.xlu0 %v784_v7, %s725_s0  ;;  %v186_v50 = vld [vmem:[#allocation2 + $0xc8] sm:$0xff]  ;;  %v185_v52 = vld [vmem:[#allocation2 + $0xc0] sm:$0xff]  ;;  %v167_v1 = vld [vmem:[#allocation2 + $0xb8] sm:$0xff]  ;;  %vm236_vm10 = vcmask 588800   ;;  %vm734_vm11 = vmmov 0   ;;  %vm557_vm12 = vcmask 64512  }
  0x16   :  { %v144_v2 = vld [vmem:[#allocation2 + $0x88] sm:$0xff]  ;;  %v166_v4 = vld [vmem:[#allocation2 + $0xb0] sm:$0xff]  ;;  %v146_v5 = vld [vmem:[#allocation2 + $0x98] sm:$0xff]  ;;  %s735_s20 = smov [#allocation5]  }
  0x17   :  { %v165_v3 = vld [vmem:[#allocation2 + $0xa8] sm:$0xff]  ;;  %v164_v8 = vld [vmem:[#allocation2 + $0xa0] sm:$0xff]  ;;  %s638_s21 = sshll.u32 %s735_s20, 4  ;;  %s639_s21 = int_to_ptr.vmem [resolvable:$true] %s638_s21 }
  0x18   :  { %v386_v14 = vld [vmem:[%s910_s3] sm:$0xff]  ;;  %p702_p6 = scmp.lt.s32.totalorder %s639_s21, %s639_s21 }
  0x19   :  { %197 = vrot.lane.b32.xlu0 %v781_v6, %s725_s0  ;;  %195 = vrot.lane.b32.xlu1 %v794_v11, %s725_s0 }
  0x1d   :  { %199 = vrot.lane.b32.xlu1 %v789_v9, %s725_s0  ;;  %216 = vrot.lane.b32.xlu0 %v794_v11, %s724_s2 }
  0x21   :  { %174 = vrot.lane.b32.xlu1 %v794_v11, %s726_s8  ;;  %172 = vrot.lane.b32.xlu0 %v784_v7, %s726_s8 }
  0x25   :  { %178 = vrot.lane.b32.xlu1 %v789_v9, %s726_s8  ;;  %176 = vrot.lane.b32.xlu0 %v781_v6, %s726_s8 }
  0x29   :  { %153 = vrot.lane.b32.xlu1 %v794_v11, %s727_s9  ;;  %151 = vrot.lane.b32.xlu0 %v784_v7, %s727_s9 }
  0x2d   :  { %157 = vrot.lane.b32.xlu1 %v789_v9, %s727_s9  ;;  %155 = vrot.lane.b32.xlu0 %v781_v6, %s727_s9 }
  0x31   :  { %124 = vrot.lane.b32.xlu1 %v794_v11, %s728_s10  ;;  %122 = vrot.lane.b32.xlu0 %v784_v7, %s728_s10 }
  0x35   :  { %128 = vrot.lane.b32.xlu1 %v789_v9, %s728_s10  ;;  %126 = vrot.lane.b32.xlu0 %v781_v6, %s728_s10 }
  0x39   :  { %103 = vrot.lane.b32.xlu1 %v794_v11, %s729_s11  ;;  %101 = vrot.lane.b32.xlu0 %v784_v7, %s729_s11 }
  0x3d   :  { %107 = vrot.lane.b32.xlu1 %v789_v9, %s729_s11  ;;  %105 = vrot.lane.b32.xlu0 %v781_v6, %s729_s11 }
  0x41   :  { %82 = vrot.lane.b32.xlu1 %v794_v11, %s730_s12  ;;  %80 = vrot.lane.b32.xlu0 %v784_v7, %s730_s12 }
  0x45   :  { %86 = vrot.lane.b32.xlu1 %v789_v9, %s730_s12  ;;  %84 = vrot.lane.b32.xlu0 %v781_v6, %s730_s12 }
  0x49   :  { %59 = vrot.lane.b32.xlu1 %v794_v11, %s732_s13  ;;  %57 = vrot.lane.b32.xlu0 %v784_v7, %s732_s13 }
  0x4d   :  { %63 = vrot.lane.b32.xlu1 %v789_v9, %s732_s13  ;;  %61 = vrot.lane.b32.xlu0 %v781_v6, %s732_s13 }
  0x83   :  { %v219_v15 = vpop.permute.xlu1 %218  ;;  %v215_v16 = vpop.permute.xlu0 %214 }
  0x87   :  { %v221_v19 = vpop.permute.xlu1 %220  ;;  %v194_v20 = vpop.permute.xlu0 %193 }
  0x88   :  { %v223_v21 = vsel %vm222_vm2, %v219_v15, %v221_v19  ;;  %v226_v22 = vsel %vm222_vm2, %v221_v19, %v215_v16 }
  0x89   :  { %v234_v23 = vmul.f32 %v230_v17, %v226_v22  ;;  %v233_v24 = vmul.f32 %v229_v18, %v223_v21  ;;  %v143_v17 = vld [vmem:[#allocation2 + $0x80] sm:$0xff]  ;;  %v145_v18 = vld [vmem:[#allocation2 + $0x90] sm:$0xff]  ;;  %v148_v22 = vmul.f32 %v144_v2, %v794_v11 }
  0x8b   :  { %325 = vmatprep.subr.mxu1 %v234_v23  ;;  %v198_v25 = vpop.permute.xlu0 %197  ;;  %v196_v26 = vpop.permute.xlu1 %195 }
  0x8c   :  { %326 = vmatpush1.msra.mxu1 %v233_v24  ;;  %v203_v31 = vsel %vm201_vm3, %v196_v26, %v198_v25  ;;  %v204_v32 = vsel %vm201_vm3, %v194_v20, %v196_v26  ;;  %v150_v26 = vmul.f32 %v146_v5, %v789_v9  ;;  %v135_v9 = vld [vmem:[#allocation2 + $0x60] sm:$0xff] }
  0x8d   :  { %v211_v45 = vmul.f32 %v207_v35, %v203_v31  ;;  %v210_v48 = vmul.f32 %v206_v40, %v204_v32  ;;  %v138_v35 = vld [vmem:[#allocation2 + $0x78] sm:$0xff] }
  0x8f   :  { %v200_v33 = vpop.permute.xlu1 %199  ;;  %v217_v34 = vpop.permute.xlu0 %216 }
  0x90   :  { %v202_v36 = vsel %vm201_vm3, %v198_v25, %v200_v33  ;;  %v205_v37 = vsel %vm201_vm3, %v200_v33, %v194_v20  ;;  %v225_v38 = vsel %vm222_vm2, %v215_v16, %v217_v34  ;;  %v224_v39 = vsel %vm222_vm2, %v217_v34, %v219_v15  ;;  %v137_v34 = vld [vmem:[#allocation2 + $0x70] sm:$0xff] }
  0x91   :  { %v212_v41 = vmul.f32 %v208_v27, %v202_v36  ;;  %v213_v42 = vmul.f32 %v209_v28, %v205_v37  ;;  %v232_v43 = vmul.f32 %v228_v29, %v224_v39  ;;  %v231_v44 = vmul.f32 %v227_v30, %v225_v38  ;;  %v136_v28 = vld [vmem:[#allocation2 + $0x68] sm:$0xff] }
  0x92   :  { %v147_v29 = vmul.f32 %v143_v17, %v784_v7  ;;  %v149_v30 = vmul.f32 %v145_v18, %v781_v6  ;;  %v73_v17 = vld [vmem:[#allocation2 + $0x8] sm:$0xff] }
  0x93   :  { %327 = vmatprep.subr.mxu1 %v213_v42  ;;  %v175_v46 = vpop.permute.xlu1 %174  ;;  %254 = vmatprep.subr.mxu0 %v232_v43  ;;  %v173_v47 = vpop.permute.xlu0 %172  ;;  %v115_v42 = vld [vmem:[#allocation2 + $0x48] sm:$0xff] }
  0x94   :  { %255 = vmatpush1.msra.mxu0 %v231_v44  ;;  %328 = vmatpush1.msra.mxu1 %v212_v41  ;;  %v183_v53 = vsel %vm180_vm4, %v173_v47, %v175_v46 }
  0x95   :  { %256 = vmatprep.subr.mxu0 %v211_v45  ;;  %v189_v62 = vmul.f32 %v185_v52, %v183_v53 }
  0x96   :  { %257 = vmatpush1.msra.mxu0 %v210_v48  ;;  %v116_v48 = vld [vmem:[#allocation2 + $0x50] sm:$0xff] }
  0x97   :  { %v179_v54 = vpop.permute.xlu1 %178  ;;  %v177_v55 = vpop.permute.xlu0 %176 }
  0x98   :  { %v184_v56 = vsel %vm180_vm4, %v179_v54, %v173_v47  ;;  %v181_v57 = vsel %vm180_vm4, %v177_v55, %v179_v54  ;;  %v182_v58 = vsel %vm180_vm4, %v175_v46, %v177_v55  ;;  %v114_v47 = vld [vmem:[#allocation2 + $0x40] sm:$0xff] }
  0x99   :  { %v192_v59 = vmul.f32 %v188_v49, %v184_v56  ;;  %v190_v60 = vmul.f32 %v186_v50, %v182_v58  ;;  %v191_v61 = vmul.f32 %v187_v51, %v181_v57  ;;  %v117_v49 = vld [vmem:[#allocation2 + $0x58] sm:$0xff]  ;;  %v94_v58 = vld [vmem:[#allocation2 + $0x28] sm:$0xff] }
  0x9b   :  { %v154_v63 = vpop.permute.xlu1 %153  ;;  %258 = vmatprep.subr.mxu0 %v190_v60  ;;  %329 = vmatprep.subr.mxu1 %v192_v59  ;;  %v152_v0 = vpop.permute.xlu0 %151 }
  0x9c   :  { %259 = vmatpush1.msra.mxu0 %v189_v62  ;;  %330 = vmatpush1.msra.mxu1 %v191_v61  ;;  %v162_v10 = vsel %vm159_vm5, %v152_v0, %v154_v63 }
  0x9d   :  { %v168_v27 = vmul.f32 %v164_v8, %v162_v10 }
  0x9f   :  { %v158_v15 = vpop.permute.xlu1 %157  ;;  %v156_v16 = vpop.permute.xlu0 %155 }
  0xa0   :  { %v163_v19 = vsel %vm159_vm5, %v158_v15, %v152_v0  ;;  %v160_v20 = vsel %vm159_vm5, %v156_v16, %v158_v15  ;;  %v161_v21 = vsel %vm159_vm5, %v154_v63, %v156_v16  ;;  %v93_v63 = vld [vmem:[#allocation2 + $0x20] sm:$0xff]  ;;  %v95_v0 = vld [vmem:[#allocation2 + $0x30] sm:$0xff] }
  0xa1   :  { %v171_v23 = vmul.f32 %v167_v1, %v163_v19  ;;  %v169_v24 = vmul.f32 %v165_v3, %v161_v21  ;;  %v170_v25 = vmul.f32 %v166_v4, %v160_v20  ;;  %v96_v1 = vld [vmem:[#allocation2 + $0x38] sm:$0xff] }
  0xa3   :  { %v125_v31 = vpop.permute.xlu1 %124  ;;  %260 = vmatprep.subr.mxu0 %v169_v24  ;;  %331 = vmatprep.subr.mxu1 %v171_v23  ;;  %v123_v32 = vpop.permute.xlu0 %122  ;;  %v74_v23 = vld [vmem:[#allocation2 + $0x10] sm:$0xff]  ;;  %v75_v24 = vld [vmem:[#allocation2 + $0x18] sm:$0xff] }
  0xa4   :  { %v133_v33 = vsel %vm130_vm6, %v123_v32, %v125_v31  ;;  %261 = vmatpush1.msra.mxu0 %v168_v27  ;;  %332 = vmatpush1.msra.mxu1 %v170_v25 }
  0xa5   :  { %v140_v11 = vmul.f32 %v136_v28, %v133_v33  ;;  %262 = vmatprep.subr.mxu0 %v148_v22  ;;  %333 = vmatprep.subr.mxu1 %v150_v26  ;;  %v72_v22 = vld [vmem:[#allocation2] sm:$0xff] }
  0xa6   :  { %263 = vmatpush1.msra.mxu0 %v147_v29  ;;  %334 = vmatpush1.msra.mxu1 %v149_v30  ;;  %v235_v33 = vld [vmem:[%s908_s1] sm:$0xff] }
  0xa7   :  { %v129_v7 = vpop.permute.xlu1 %128  ;;  %v127_v36 = vpop.permute.xlu0 %126  ;;  %264 = vmatprep.subr.mxu0 %v140_v11  ;;  %v733_v11 = vmov 1983009808  }
  0xa8   :  { %v134_v6 = vsel %vm130_vm6, %v129_v7, %v123_v32  ;;  %v131_v37 = vsel %vm130_vm6, %v127_v36, %v129_v7  ;;  %v132_v38 = vsel %vm130_vm6, %v125_v31, %v127_v36  ;;  %v388_v36 = vcombine.high %v386_v14, %v386_v14 }
  0xa9   :  { %v139_v39 = vmul.f32 %v135_v9, %v134_v6  ;;  %v141_v40 = vmul.f32 %v137_v34, %v132_v38  ;;  %v142_v41 = vmul.f32 %v138_v35, %v131_v37  ;;  %v390_v9 = vunpack.c.l.s4 %v733_v11 }
  0xaa   :  { %v393_v35 = vshrl.u32 %v65_v13, 7 }
  0xab   :  { %v104_v43 = vpop.permute.xlu1 %103  ;;  %335 = vmatprep.subr.mxu1 %v142_v41  ;;  %v102_v44 = vpop.permute.xlu0 %101  ;;  %265 = vmatpush1.msra.mxu0 %v139_v39  ;;  %v391_v34 = vunpack.c.0.s8 %v390_v9 }
  0xac   :  { %v112_v45 = vsel %vm109_vm7, %v102_v44, %v104_v43  ;;  %336 = vmatpush1.msra.mxu1 %v141_v40 }
  0xad   :  { %v119_v46 = vmul.f32 %v115_v42, %v112_v45  ;;  %v394_v7 = vsub.s32 %v391_v34, %v393_v35 }
  0xaf   :  { %v108_v50 = vpop.permute.xlu1 %107  ;;  %v106_v51 = vpop.permute.xlu0 %105  ;;  %266 = vmatprep.subr.mxu0 %v119_v46  ;;  %v395_v6 = vrot.slane %v386_v14, %v394_v7  ;;  %v402_v37 = vrot.slane %v388_v36, %v394_v7 }
  0xb0   :  { %v113_v52 = vsel %vm109_vm7, %v108_v50, %v102_v44  ;;  %v110_v53 = vsel %vm109_vm7, %v106_v51, %v108_v50  ;;  %v111_v54 = vsel %vm109_vm7, %v104_v43, %v106_v51 }
  0xb1   :  { %v118_v55 = vmul.f32 %v114_v47, %v113_v52  ;;  %v120_v56 = vmul.f32 %v116_v48, %v111_v54  ;;  %v121_v57 = vmul.f32 %v117_v49, %v110_v53  ;;  %v403_v38 = vcombine.high %v395_v6, %v395_v6  ;;  %v549_v47 = vld [vmem:[%s911_s4] sm:$0xff]  ;;  %s697_s4 = scalar_lea.vmem %s639_s21, 32 }
  0xb2   :  { %v404_v39 = vcombine.high %v402_v37, %v402_v37  ;;  %v650_v53 = vld [vmem:[%s912_s5] ss:$0 sm:$0xff]  ;;  %p698_p5 = scmp.ne.s32.totalorder %s639_s21, %s697_s4  ;;  %p703_p7 = scmp.lt.s32.totalorder %s697_s4, %s697_s4 }
  0xb3   :  { %v83_v59 = vpop.permute.xlu1 %82  ;;  %337 = vmatprep.subr.mxu1 %v121_v57  ;;  %v81_v60 = vpop.permute.xlu0 %80  ;;  %267 = vmatpush1.msra.mxu0 %v118_v55 }
  0xb4   :  { %v91_v61 = vsel %vm88_vm8, %v81_v60, %v83_v59  ;;  %338 = vmatpush1.msra.mxu1 %v120_v56  ;;  %p704_p8 = por %p703_p7, %p702_p6 }
  0xb5   :  { %v98_v62 = vmul.f32 %v94_v58, %v91_v61 }
  0xb6   :  { %p705_p9 = pnand %p704_p8, %p698_p5 }
  0xb7   :  { %v87_v2 = vpop.permute.xlu1 %86  ;;  %v85_v3 = vpop.permute.xlu0 %84  ;;  %268 = vmatprep.subr.mxu0 %v98_v62 }
  0xb8   :  { %v92_v4 = vsel %vm88_vm8, %v87_v2, %v81_v60  ;;  %v89_v5 = vsel %vm88_vm8, %v85_v3, %v87_v2  ;;  %v90_v8 = vsel %vm88_vm8, %v83_v59, %v85_v3 }
  0xb9   :  { %v97_v10 = vmul.f32 %v93_v63, %v92_v4  ;;  %v99_v15 = vmul.f32 %v95_v0, %v90_v8  ;;  %v100_v16 = vmul.f32 %v96_v1, %v89_v5 }
  0xbb   :  { %v60_v18 = vpop.permute.xlu1 %59  ;;  %339 = vmatprep.subr.mxu1 %v100_v16  ;;  %v58_v19 = vpop.permute.xlu0 %57  ;;  %269 = vmatpush1.msra.mxu0 %v97_v10 }
  0xbc   :  { %v70_v20 = vsel %vm67_vm9, %v58_v19, %v60_v18  ;;  %340 = vmatpush1.msra.mxu1 %v99_v15 }
  0xbd   :  { %v77_v21 = vmul.f32 %v73_v17, %v70_v20 }
  0xbf   :  { %v64_v25 = vpop.permute.xlu1 %63  ;;  %v62_v26 = vpop.permute.xlu0 %61  ;;  %270 = vmatprep.subr.mxu0 %v77_v21 }
  0xc0   :  { %v71_v27 = vsel %vm67_vm9, %v64_v25, %v58_v19  ;;  %v68_v28 = vsel %vm67_vm9, %v62_v26, %v64_v25  ;;  %v69_v29 = vsel %vm67_vm9, %v60_v18, %v62_v26 }
  0xc1   :  { %v76_v30 = vmul.f32 %v72_v22, %v71_v27  ;;  %v78_v31 = vmul.f32 %v74_v23, %v69_v29  ;;  %v79_v32 = vmul.f32 %v75_v24, %v68_v28 }
  0xc3   :  { %271 = vmatpush1.msra.mxu0 %v76_v30  ;;  %341 = vmatprep.subr.mxu1 %v79_v32 }
  0xc4   :  { %648 = vmatmul.mubr.msk.f32.vlgmr.msra.gmra.mxu0 %vm236_vm10, %v235_v33  ;;  %342 = vmatpush1.msra.mxu1 %v78_v31 }
  0xc5   :  { %649 = vmatmul.mubr.msk.f32.vlgmr.msra.gmra.mxu1 %vm236_vm10, %v235_v33  ;;  %473 = vmatprep.mubr.f32.mxu0 %v403_v38 }
  0xc6   :  { %543 = vmatprep.mubr.f32.mxu1 %v404_v39 }
 0x184   :  { %v306_v40 = vpop.f32.mrf.mxu0 }
 0x185   :  { %v377_v41 = vpop.f32.mrf.mxu1  ;;  %v382_v45 = vmax.f32 %v306_v40, 0.0 }
 0x186   :  { %v308_v42 = vpop.f32.mrf.mxu0  ;;  %v384_v13 = vmax.f32 %v377_v41, 0.0 }
 0x187   :  { %v383_v43 = vmax.f32 %v308_v42, 0.0  ;;  %v379_v44 = vpop.f32.mrf.mxu1 }
 0x188   :  { %v385_v46 = vmax.f32 %v379_v44, 0.0 }
 0x189   :  { %439 = vmatprep.subr.mxu0 %v383_v43 }
 0x18a   :  { %440 = vmatpush1.xpose.msra.mxu0 %v382_v45  ;;  %509 = vmatprep.subr.mxu1 %v385_v46 }
 0x18b   :  { %510 = vmatpush1.xpose.msra.mxu1 %v384_v13  ;;  %654 = vmatprep.subr.mxu0 %v731_v12 }
 0x18d   :  { %474 = vmatmul.mubr.f32.vlgmr.msra.gmra.mxu0 %v395_v6 }
 0x18e   :  { %544 = vmatmul.mubr.f32.vlgmr.msra.gmra.mxu1 %v402_v37  ;;  %655 = vmatpush3.msra.mxu0 %v549_v47 }
 0x18f   :  { %656 = vmatprep.mubr.msk.f32.mxu0 %vm734_vm11, %v731_v12 }
 0x24d   :  { %v475_v48 = vpop.f32.mrf.mxu0 }
 0x24e   :  { %v545_v49 = vpop.f32.mrf.mxu1 }
 0x24f   :  { %v546_v50 = vadd.f32 %v545_v49, %v475_v48  ;;  %v477_v51 = vpop.f32.mrf.mxu0 }
 0x250   :  { %v547_v52 = vpop.f32.mrf.mxu1 }
 0x251   :  { %657 = vmatmul.mubr.msk.f32.vlgmr.msra.gmra.mxu0 %vm557_vm12, %v546_v50 }
 0x311   :  { %v627_v54 = vpop.f32.mrf.mxu0 }
 0x312   :  { %v628_v55 = vadd.f32 %v650_v53, %v627_v54 }
 0x313   :  { %v658_v56 = vpop.f32.mrf.mxu0 }
 0x314   :  { %631 = vst [vmem:[#allocation5] sm:$0x3] %v628_v55 }
 0x315   :  { %708 = shalt.err (!%p705_p9)
}
 0x316   :  { %641 = dma.vmem_to_hbm [thread:$0]  %s639_s21, 32, %s913_s6, [#allocation4]  }
 0x317   :  { %719 = dma.done.wait [#allocation4], 32  }
 0x318   :  { %720 = vsyncadd [#allocation4], 4294967264 }
 0x319   :  { %645 = vsyncpa [#allocation3], 1 }
 0x31a   :  { %646 = vsyncpa [#allocation4], 1 }

</bundles_post_ra>
